<compile_context>
chip_gen: v6e
topology: v6e:2x2x1
jax: 0.10.0
libtpu: 0.0.40
codegen_flags: <defaults>
</compile_context>

<pallas_src>
import functools

import jax
import jax.numpy as jnp
from jax.experimental import pallas as pl
from jax.experimental.pallas import tpu as pltpu

EPS = 1e-5
LANES = 128


def _round_up(x, m):
    return (x + m - 1) // m * m


# ----------------------------------------------------------------------------
# Pallas kernel: 3x3 conv (9 accumulating matmuls) + BN shift
#                (+ fused shortcut: 1x1 conv+BN or identity) (+ ReLU)
# ----------------------------------------------------------------------------
def _fused_conv3x3_kernel(*refs, stride, ho, wo, hq, cin, relu, res_mode):
    if res_mode == "conv":
        x_ref, w_ref, shift_ref, sc_ref, ws_ref, sshift_ref, o_ref = refs
    elif res_mode == "identity":
        x_ref, w_ref, shift_ref, r_ref, o_ref = refs
    else:
        x_ref, w_ref, shift_ref, o_ref = refs

    m = ho * wo
    tile_co = o_ref.shape[-1]
    acc = jnp.zeros((m, tile_co), jnp.float32)

    # 9 taps of the 3x3 kernel, each a (m, cin) x (cin, tile_co) bf16 MXU matmul.
    for ky in range(3):
        for kx in range(3):
            p = (ky % stride) * stride + (kx % stride)    # phase sub-image
            qy, qx = ky // stride, kx // stride           # offset inside phase
            x_tap = x_ref[0, p * hq + qy:p * hq + qy + ho, qx:qx + wo, :]
            x_mat = x_tap.reshape(m, cin)                 # (m, cin) bf16
            t = ky * 3 + kx
            w_k = w_ref[t * cin:(t + 1) * cin, :]         # (cin, tile_co) bf16
            acc = acc + jnp.dot(x_mat, w_k,
                                preferred_element_type=jnp.float32)

    y = acc + shift_ref[...]                              # folded-BN shift
    if res_mode == "conv":        # fused shortcut: 1x1 conv + BN
        y = y + jnp.dot(sc_ref[0], ws_ref[...],
                        preferred_element_type=jnp.float32) + sshift_ref[...]
    elif res_mode == "identity":  # identity residual
        y = y + r_ref[0].astype(jnp.float32)
    if relu:
        y = jnp.maximum(y, 0.0)
    o_ref[0] = y.astype(o_ref.dtype)


# ----------------------------------------------------------------------------
# Wrapper: phase decomposition + pallas_call
# ----------------------------------------------------------------------------
def fused_conv3x3(x_nhwc, w_flat, shift, *, stride, relu, res=None,
                  out_dtype=jnp.float32, tile_co_target=256):
    """3x3 conv (pad=1, stride) + folded-BN shift (+ fused residual) (+ ReLU).

    x_nhwc : (N, H, W, C), C a multiple of 8.
    w_flat : (9*C, Coutp) bf16, BN scale pre-folded, Coutp multiple of 128.
    shift  : (1, Coutp) f32.
    res    : None
             | ("identity", r)          r : (N, Ho*Wo, Coutp) bf16
             | ("conv", sc, ws, sshift) sc : (N, Ho*Wo, Csc) bf16,
                                        ws : (Csc, Coutp) bf16, sshift (1,Coutp) f32
    Returns (out, (N, Ho, Wo)) with out : (N, Ho*Wo, Coutp) out_dtype.
    """
    n, h, w, c = x_nhwc.shape
    coutp = w_flat.shape[1]
    ho = (h + 2 - 3) // stride + 1
    wo = (w + 2 - 3) // stride + 1
    m = ho * wo
    hq = ho + 2 // stride
    wq = wo + 2 // stride
    pad_b = stride * hq - (h + 2)
    pad_r = stride * wq - (w + 2)

    xp = jnp.pad(x_nhwc, ((0, 0), (1, 1 + pad_b), (1, 1 + pad_r),
                          (0, 0))).astype(jnp.bfloat16)
    # Phase decomposition: tap (ky,kx) of a stride-s conv is a contiguous
    # (ho, wo) window of phase (ky%s, kx%s). Same total bytes as the padded
    # image (no im2col amplification); kernel slices are static and stride-1.
    phases = jnp.concatenate(
        [xp[:, ry::stride, rx::stride, :]
         for ry in range(stride) for rx in range(stride)], axis=1)
    # phases : (N, stride*stride*hq, wq, C)

    tile_co = min(tile_co_target, coutp)
    while coutp % tile_co:
        tile_co //= 2
    n_co = coutp // tile_co

    in_specs = [
        pl.BlockSpec((1, stride * stride * hq, wq, c), lambda i, j: (i, 0, 0, 0)),
        pl.BlockSpec((w_flat.shape[0], tile_co), lambda i, j: (0, j)),
        pl.BlockSpec((1, tile_co), lambda i, j: (0, j)),
    ]
    args = [phases, w_flat, shift]

    res_mode = "none"
    if res is not None:
        if res[0] == "identity":
            res_mode = "identity"
            in_specs.append(pl.BlockSpec((1, m, tile_co), lambda i, j: (i, 0, j)))
            args.append(res[1])
        else:
            res_mode = "conv"
            _, sc, ws, sshift = res
            in_specs += [
                pl.BlockSpec((1, m, sc.shape[-1]), lambda i, j: (i, 0, 0)),
                pl.BlockSpec((ws.shape[0], tile_co), lambda i, j: (0, j)),
                pl.BlockSpec((1, tile_co), lambda i, j: (0, j)),
            ]
            args += [sc, ws, sshift]

    kernel = functools.partial(
        _fused_conv3x3_kernel, stride=stride, ho=ho, wo=wo, hq=hq, cin=c,
        relu=relu, res_mode=res_mode)

    out = pl.pallas_call(
        kernel,
        out_shape=jax.ShapeDtypeStruct((n, m, coutp), out_dtype),
        grid=(n, n_co),
        in_specs=in_specs,
        out_specs=pl.BlockSpec((1, m, tile_co), lambda i, j: (i, 0, j)),
        compiler_params=pltpu.CompilerParams(
            dimension_semantics=("parallel", "parallel"),
            vmem_limit_bytes=48 * 1024 * 1024),
    )(*args)
    return out, (n, ho, wo)


# ----------------------------------------------------------------------------
# Plain-JAX glue: BN folding, weight prep, parameter init
# ----------------------------------------------------------------------------
def fold_bn(gamma, beta, mean, var, eps=EPS):
    scale = gamma / jnp.sqrt(var + eps)
    return scale, beta - mean * scale


def prep_w3x3(w_oihw, scale, cinp, coutp):
    """Torch (Cout,Cin,3,3) -> (9*cinp, coutp) bf16 with BN scale folded in."""
    cout, cin = w_oihw.shape[0], w_oihw.shape[1]
    w = jnp.transpose(w_oihw, (2, 3, 1, 0)) * scale[None, None, None, :]
    w = jnp.pad(w, ((0, 0), (0, 0), (0, cinp - cin), (0, coutp - cout)))
    return w.reshape(9 * cinp, coutp).astype(jnp.bfloat16)


def pad_shift(shift, coutp):
    return jnp.pad(shift, (0, coutp - shift.shape[0])).reshape(
        1, coutp).astype(jnp.float32)


def pad_channels(x_nhwc, cp):
    c = x_nhwc.shape[-1]
    if c == cp:
        return x_nhwc
    return jnp.pad(x_nhwc, ((0, 0), (0, 0), (0, 0), (0, cp - c)))


def init_basic_block_params(key, cin, cout):
    ks = jax.random.split(key, 12)
    return {
        "w1": 0.1 * jax.random.normal(ks[0], (cout, cin, 3, 3), jnp.float32),
        "g1": jax.random.uniform(ks[1], (cout,), jnp.float32, 0.5, 1.5),
        "b1": 0.1 * jax.random.normal(ks[2], (cout,), jnp.float32),
        "m1": 0.1 * jax.random.normal(ks[3], (cout,), jnp.float32),
        "v1": jax.random.uniform(ks[4], (cout,), jnp.float32, 0.5, 1.5),
        "w2": 0.1 * jax.random.normal(ks[5], (cout, cout, 3, 3), jnp.float32),
        "g2": jax.random.uniform(ks[6], (cout,), jnp.float32, 0.5, 1.5),
        "b2": 0.1 * jax.random.normal(ks[7], (cout,), jnp.float32),
        "m2": 0.1 * jax.random.normal(ks[8], (cout,), jnp.float32),
        "v2": jax.random.uniform(ks[9], (cout,), jnp.float32, 0.5, 1.5),
        "ws": 0.1 * jax.random.normal(ks[10], (cout, cin, 1, 1), jnp.float32),
        "gs": jnp.ones((cout,), jnp.float32),
        "bs": jnp.zeros((cout,), jnp.float32),
        "ms": jnp.zeros((cout,), jnp.float32),
        "vs": jnp.ones((cout,), jnp.float32),
    }


# ----------------------------------------------------------------------------
# BasicBlock forward (Pallas)
# ----------------------------------------------------------------------------
def basic_block_forward(x_nchw, params, cin, cout, stride):
    x = jnp.transpose(x_nchw, (0, 2, 3, 1)).astype(jnp.float32)   # NHWC
    n, h, w, _ = x.shape
    cinp = _round_up(cin, 8)
    coutp = _round_up(cout, LANES)

    # conv1 (3x3, stride) + BN + ReLU  -> bf16 intermediate
    s1, sh1 = fold_bn(params["g1"], params["b1"], params["m1"], params["v1"])
    w1 = prep_w3x3(params["w1"], s1, cinp, coutp)
    y1, (n, ho, wo) = fused_conv3x3(
        pad_channels(x, cinp), w1, pad_shift(sh1, coutp),
        stride=stride, relu=True, out_dtype=jnp.bfloat16)
    y1_img = y1.reshape(n, ho, wo, coutp)

    # shortcut operands (fused into conv2's epilogue)
    if stride != 1 or cin != cout:
        ss, shs = fold_bn(params["gs"], params["bs"], params["ms"], params["vs"])
        ws = params["ws"][:, :, 0, 0].T * ss[None, :]              # (cin, cout)
        ws = jnp.pad(ws, ((0, 0), (0, coutp - cout))).astype(jnp.bfloat16)
        sc = x[:, ::stride, ::stride, :].reshape(
            n, ho * wo, cin).astype(jnp.bfloat16)
        res = ("conv", sc, ws, pad_shift(shs, coutp))
    else:
        ident = pad_channels(x, coutp).reshape(
            n, h * w, coutp).astype(jnp.bfloat16)
        res = ("identity", ident)

    # conv2 (3x3, stride 1) + BN + residual add + ReLU, all fused in one kernel
    s2, sh2 = fold_bn(params["g2"], params["b2"], params["m2"], params["v2"])
    w2 = prep_w3x3(params["w2"], s2, coutp, coutp)
    out, _ = fused_conv3x3(
        y1_img, w2, pad_shift(sh2, coutp),
        stride=1, relu=True, res=res, out_dtype=jnp.float32)

    out = out.reshape(n, ho, wo, coutp)[..., :cout]
    return jnp.transpose(out, (0, 3, 1, 2))                       # NCHW


# ----------------------------------------------------------------------------
# Pure-JAX reference (for correctness check)
# ----------------------------------------------------------------------------
def _conv_nhwc(x, w_oihw, stride, pad):
    return jax.lax.conv_general_dilated(
        x, jnp.transpose(w_oihw, (2, 3, 1, 0)),
        window_strides=(stride, stride),
        padding=[(pad, pad), (pad, pad)],
        dimension_numbers=("NHWC", "HWIO", "NHWC"))


def _bn(x, g, b, m, v):
    return (x - m) / jnp.sqrt(v + EPS) * g + b


def basic_block_ref(x_nchw, p, cin, cout, stride):
    x = jnp.transpose(x_nchw, (0, 2, 3, 1)).astype(jnp.float32)
    y = jax.nn.relu(_bn(_conv_nhwc(x, p["w1"], stride, 1),
                        p["g1"], p["b1"], p["m1"], p["v1"]))
    y = _bn(_conv_nhwc(y, p["w2"], 1, 1), p["g2"], p["b2"], p["m2"], p["v2"])
    if stride != 1 or cin != cout:
        sc = _bn(_conv_nhwc(x, p["ws"], stride, 0),
                 p["gs"], p["bs"], p["ms"], p["vs"])
    else:
        sc = x
    return jnp.transpose(jax.nn.relu(y + sc), (0, 3, 1, 2))


# ----------------------------------------------------------------------------
if __name__ == "__main__":
    key = jax.random.PRNGKey(0)
    k_x, k_p, k_x2, k_p2 = jax.random.split(key, 4)

    # config 1: projection shortcut (stride 2, channel change)
    N, CIN, COUT, H, W, STRIDE = 2, 4, 8, 16, 16, 2
    x = jax.random.normal(k_x, (N, CIN, H, W), jnp.float32)   # NCHW like torch
    params = init_basic_block_params(k_p, CIN, COUT)
    out = jax.block_until_ready(basic_block_forward(x, params, CIN, COUT, STRIDE))
    ref = jax.block_until_ready(basic_block_ref(x, params, CIN, COUT, STRIDE))
    assert out.shape == (N, COUT, H // STRIDE, W // STRIDE), out.shape
    # bf16 matmul operands -> loosened tolerance vs the f32 reference.
    assert jnp.allclose(out, ref, rtol=5e-2, atol=5e-2), (
        float(jnp.max(jnp.abs(out - ref))))

    # config 2: identity shortcut (stride 1, same channels)
    N2, C2, H2, W2 = 2, 8, 16, 16
    x2 = jax.random.normal(k_x2, (N2, C2, H2, W2), jnp.float32)
    params2 = init_basic_block_params(k_p2, C2, C2)
    out2 = jax.block_until_ready(basic_block_forward(x2, params2, C2, C2, 1))
    ref2 = jax.block_until_ready(basic_block_ref(x2, params2, C2, C2, 1))
    assert out2.shape == (N2, C2, H2, W2), out2.shape
    assert jnp.allclose(out2, ref2, rtol=5e-2, atol=5e-2), (
        float(jnp.max(jnp.abs(out2 - ref2))))

    print("KERNEL_OK")
</pallas_src>

<mosaic_0001>
module attributes {stable_mosaic.version = 11 : i64} {
  func.func @_fused_conv3x3_kernel(%arg0: i32, %arg1: i32, %arg2: memref<1x36x9x8xbf16, #tpu.memory_space<vmem>>, %arg3: memref<72x128xbf16, #tpu.memory_space<vmem>>, %arg4: memref<1x128xf32, #tpu.memory_space<vmem>>, %arg5: memref<1x64x128xbf16, #tpu.memory_space<vmem>>) attributes {dimension_semantics = [#tpu.dimension_semantics<parallel>, #tpu.dimension_semantics<parallel>], iteration_bounds = array<i64: 2, 1>, scalar_prefetch = 0 : i64, scratch_operands = 0 : i64, tpu.core_type = #tpu.core_type<tc>, window_params = [{transform_indices = @transform_0, window_bounds = array<i64: 1, 36, 9, 8>}, {transform_indices = @transform_1, window_bounds = array<i64: 72, 128>}, {transform_indices = @transform_2, window_bounds = array<i64: 1, 128>}, {transform_indices = @transform_3, window_bounds = array<i64: 1, 64, 128>}]} {
    %cst = arith.constant 0.000000e+00 : f32
    %0 = vector.broadcast %cst : f32 to vector<64x128xf32>
    %c0 = arith.constant 0 : index
    %c0_0 = arith.constant 0 : index
    %c0_1 = arith.constant 0 : index
    %c0_2 = arith.constant 0 : index
    %1 = vector.load %arg2[%c0, %c0_0, %c0_1, %c0_2] : memref<1x36x9x8xbf16, #tpu.memory_space<vmem>>, vector<1x8x8x8xbf16>
    %2 = vector.shape_cast %1 : vector<1x8x8x8xbf16> to vector<8x8x8xbf16>
    %3 = vector.shape_cast %2 : vector<8x8x8xbf16> to vector<64x8xbf16>
    %c0_3 = arith.constant 0 : index
    %c0_4 = arith.constant 0 : index
    %4 = vector.load %arg3[%c0_3, %c0_4] : memref<72x128xbf16, #tpu.memory_space<vmem>>, vector<8x128xbf16>
    %cst_5 = arith.constant dense<0.000000e+00> : vector<64x128xf32>
    %5 = tpu.matmul %3, %4, %cst_5 {dimension_numbers = #tpu.dot_dimension_numbers<[1], [0], [0], [1], [0, 0, 1, 1], [], []>} : vector<64x8xbf16>, vector<8x128xbf16>, vector<64x128xf32> -> vector<64x128xf32>
    %6 = arith.addf %0, %5 : vector<64x128xf32>
    %c0_6 = arith.constant 0 : index
    %c9 = arith.constant 9 : index
    %c0_7 = arith.constant 0 : index
    %c0_8 = arith.constant 0 : index
    %7 = vector.load %arg2[%c0_6, %c9, %c0_7, %c0_8] : memref<1x36x9x8xbf16, #tpu.memory_space<vmem>>, vector<1x8x8x8xbf16>
    %8 = vector.shape_cast %7 : vector<1x8x8x8xbf16> to vector<8x8x8xbf16>
    %9 = vector.shape_cast %8 : vector<8x8x8xbf16> to vector<64x8xbf16>
    %c8 = arith.constant 8 : index
    %c0_9 = arith.constant 0 : index
    %10 = vector.load %arg3[%c8, %c0_9] : memref<72x128xbf16, #tpu.memory_space<vmem>>, vector<8x128xbf16>
    %cst_10 = arith.constant dense<0.000000e+00> : vector<64x128xf32>
    %11 = tpu.matmul %9, %10, %cst_10 {dimension_numbers = #tpu.dot_dimension_numbers<[1], [0], [0], [1], [0, 0, 1, 1], [], []>} : vector<64x8xbf16>, vector<8x128xbf16>, vector<64x128xf32> -> vector<64x128xf32>
    %12 = arith.addf %6, %11 : vector<64x128xf32>
    %c0_11 = arith.constant 0 : index
    %c0_12 = arith.constant 0 : index
    %c1 = arith.constant 1 : index
    %c0_13 = arith.constant 0 : index
    %13 = vector.load %arg2[%c0_11, %c0_12, %c1, %c0_13] : memref<1x36x9x8xbf16, #tpu.memory_space<vmem>>, vector<1x8x8x8xbf16>
    %14 = vector.shape_cast %13 : vector<1x8x8x8xbf16> to vector<8x8x8xbf16>
    %15 = vector.shape_cast %14 : vector<8x8x8xbf16> to vector<64x8xbf16>
    %c16 = arith.constant 16 : index
    %c0_14 = arith.constant 0 : index
    %16 = vector.load %arg3[%c16, %c0_14] : memref<72x128xbf16, #tpu.memory_space<vmem>>, vector<8x128xbf16>
    %cst_15 = arith.constant dense<0.000000e+00> : vector<64x128xf32>
    %17 = tpu.matmul %15, %16, %cst_15 {dimension_numbers = #tpu.dot_dimension_numbers<[1], [0], [0], [1], [0, 0, 1, 1], [], []>} : vector<64x8xbf16>, vector<8x128xbf16>, vector<64x128xf32> -> vector<64x128xf32>
    %18 = arith.addf %12, %17 : vector<64x128xf32>
    %c0_16 = arith.constant 0 : index
    %c18 = arith.constant 18 : index
    %c0_17 = arith.constant 0 : index
    %c0_18 = arith.constant 0 : index
    %19 = vector.load %arg2[%c0_16, %c18, %c0_17, %c0_18] : memref<1x36x9x8xbf16, #tpu.memory_space<vmem>>, vector<1x8x8x8xbf16>
    %20 = vector.shape_cast %19 : vector<1x8x8x8xbf16> to vector<8x8x8xbf16>
    %21 = vector.shape_cast %20 : vector<8x8x8xbf16> to vector<64x8xbf16>
    %c24 = arith.constant 24 : index
    %c0_19 = arith.constant 0 : index
    %22 = vector.load %arg3[%c24, %c0_19] : memref<72x128xbf16, #tpu.memory_space<vmem>>, vector<8x128xbf16>
    %cst_20 = arith.constant dense<0.000000e+00> : vector<64x128xf32>
    %23 = tpu.matmul %21, %22, %cst_20 {dimension_numbers = #tpu.dot_dimension_numbers<[1], [0], [0], [1], [0, 0, 1, 1], [], []>} : vector<64x8xbf16>, vector<8x128xbf16>, vector<64x128xf32> -> vector<64x128xf32>
    %24 = arith.addf %18, %23 : vector<64x128xf32>
    %c0_21 = arith.constant 0 : index
    %c27 = arith.constant 27 : index
    %c0_22 = arith.constant 0 : index
    %c0_23 = arith.constant 0 : index
    %25 = vector.load %arg2[%c0_21, %c27, %c0_22, %c0_23] : memref<1x36x9x8xbf16, #tpu.memory_space<vmem>>, vector<1x8x8x8xbf16>
    %26 = vector.shape_cast %25 : vector<1x8x8x8xbf16> to vector<8x8x8xbf16>
    %27 = vector.shape_cast %26 : vector<8x8x8xbf16> to vector<64x8xbf16>
    %c32 = arith.constant 32 : index
    %c0_24 = arith.constant 0 : index
    %28 = vector.load %arg3[%c32, %c0_24] : memref<72x128xbf16, #tpu.memory_space<vmem>>, vector<8x128xbf16>
    %cst_25 = arith.constant dense<0.000000e+00> : vector<64x128xf32>
    %29 = tpu.matmul %27, %28, %cst_25 {dimension_numbers = #tpu.dot_dimension_numbers<[1], [0], [0], [1], [0, 0, 1, 1], [], []>} : vector<64x8xbf16>, vector<8x128xbf16>, vector<64x128xf32> -> vector<64x128xf32>
    %30 = arith.addf %24, %29 : vector<64x128xf32>
    %c0_26 = arith.constant 0 : index
    %c18_27 = arith.constant 18 : index
    %c1_28 = arith.constant 1 : index
    %c0_29 = arith.constant 0 : index
    %31 = vector.load %arg2[%c0_26, %c18_27, %c1_28, %c0_29] : memref<1x36x9x8xbf16, #tpu.memory_space<vmem>>, vector<1x8x8x8xbf16>
    %32 = vector.shape_cast %31 : vector<1x8x8x8xbf16> to vector<8x8x8xbf16>
    %33 = vector.shape_cast %32 : vector<8x8x8xbf16> to vector<64x8xbf16>
    %c40 = arith.constant 40 : index
    %c0_30 = arith.constant 0 : index
    %34 = vector.load %arg3[%c40, %c0_30] : memref<72x128xbf16, #tpu.memory_space<vmem>>, vector<8x128xbf16>
    %cst_31 = arith.constant dense<0.000000e+00> : vector<64x128xf32>
    %35 = tpu.matmul %33, %34, %cst_31 {dimension_numbers = #tpu.dot_dimension_numbers<[1], [0], [0], [1], [0, 0, 1, 1], [], []>} : vector<64x8xbf16>, vector<8x128xbf16>, vector<64x128xf32> -> vector<64x128xf32>
    %36 = arith.addf %30, %35 : vector<64x128xf32>
    %c0_32 = arith.constant 0 : index
    %c1_33 = arith.constant 1 : index
    %c0_34 = arith.constant 0 : index
    %c0_35 = arith.constant 0 : index
    %37 = vector.load %arg2[%c0_32, %c1_33, %c0_34, %c0_35] : memref<1x36x9x8xbf16, #tpu.memory_space<vmem>>, vector<1x8x8x8xbf16>
    %38 = vector.shape_cast %37 : vector<1x8x8x8xbf16> to vector<8x8x8xbf16>
    %39 = vector.shape_cast %38 : vector<8x8x8xbf16> to vector<64x8xbf16>
    %c48 = arith.constant 48 : index
    %c0_36 = arith.constant 0 : index
    %40 = vector.load %arg3[%c48, %c0_36] : memref<72x128xbf16, #tpu.memory_space<vmem>>, vector<8x128xbf16>
    %cst_37 = arith.constant dense<0.000000e+00> : vector<64x128xf32>
    %41 = tpu.matmul %39, %40, %cst_37 {dimension_numbers = #tpu.dot_dimension_numbers<[1], [0], [0], [1], [0, 0, 1, 1], [], []>} : vector<64x8xbf16>, vector<8x128xbf16>, vector<64x128xf32> -> vector<64x128xf32>
    %42 = arith.addf %36, %41 : vector<64x128xf32>
    %c0_38 = arith.constant 0 : index
    %c10 = arith.constant 10 : index
    %c0_39 = arith.constant 0 : index
    %c0_40 = arith.constant 0 : index
    %43 = vector.load %arg2[%c0_38, %c10, %c0_39, %c0_40] : memref<1x36x9x8xbf16, #tpu.memory_space<vmem>>, vector<1x8x8x8xbf16>
    %44 = vector.shape_cast %43 : vector<1x8x8x8xbf16> to vector<8x8x8xbf16>
    %45 = vector.shape_cast %44 : vector<8x8x8xbf16> to vector<64x8xbf16>
    %c56 = arith.constant 56 : index
    %c0_41 = arith.constant 0 : index
    %46 = vector.load %arg3[%c56, %c0_41] : memref<72x128xbf16, #tpu.memory_space<vmem>>, vector<8x128xbf16>
    %cst_42 = arith.constant dense<0.000000e+00> : vector<64x128xf32>
    %47 = tpu.matmul %45, %46, %cst_42 {dimension_numbers = #tpu.dot_dimension_numbers<[1], [0], [0], [1], [0, 0, 1, 1], [], []>} : vector<64x8xbf16>, vector<8x128xbf16>, vector<64x128xf32> -> vector<64x128xf32>
    %48 = arith.addf %42, %47 : vector<64x128xf32>
    %c0_43 = arith.constant 0 : index
    %c1_44 = arith.constant 1 : index
    %c1_45 = arith.constant 1 : index
    %c0_46 = arith.constant 0 : index
    %49 = vector.load %arg2[%c0_43, %c1_44, %c1_45, %c0_46] : memref<1x36x9x8xbf16, #tpu.memory_space<vmem>>, vector<1x8x8x8xbf16>
    %50 = vector.shape_cast %49 : vector<1x8x8x8xbf16> to vector<8x8x8xbf16>
    %51 = vector.shape_cast %50 : vector<8x8x8xbf16> to vector<64x8xbf16>
    %c64 = arith.constant 64 : index
    %c0_47 = arith.constant 0 : index
    %52 = vector.load %arg3[%c64, %c0_47] : memref<72x128xbf16, #tpu.memory_space<vmem>>, vector<8x128xbf16>
    %cst_48 = arith.constant dense<0.000000e+00> : vector<64x128xf32>
    %53 = tpu.matmul %51, %52, %cst_48 {dimension_numbers = #tpu.dot_dimension_numbers<[1], [0], [0], [1], [0, 0, 1, 1], [], []>} : vector<64x8xbf16>, vector<8x128xbf16>, vector<64x128xf32> -> vector<64x128xf32>
    %54 = arith.addf %48, %53 : vector<64x128xf32>
    %c0_49 = arith.constant 0 : index
    %c0_50 = arith.constant 0 : index
    %55 = vector.load %arg4[%c0_49, %c0_50] : memref<1x128xf32, #tpu.memory_space<vmem>>, vector<1x128xf32>
    %56 = vector.broadcast %55 : vector<1x128xf32> to vector<64x128xf32>
    %57 = arith.addf %54, %56 : vector<64x128xf32>
    %cst_51 = arith.constant 0.000000e+00 : f32
    %58 = vector.broadcast %cst_51 : f32 to vector<64x128xf32>
    %59 = arith.maximumf %57, %58 : vector<64x128xf32>
    %60 = arith.truncf %59 : vector<64x128xf32> to vector<64x128xbf16>
    %c0_52 = arith.constant 0 : index
    %c0_53 = arith.constant 0 : index
    %c0_54 = arith.constant 0 : index
    %61 = vector.load %arg5[%c0_52, %c0_53, %c0_54] : memref<1x64x128xbf16, #tpu.memory_space<vmem>>, vector<1x64x128xbf16>
    %62 = vector.shape_cast %61 : vector<1x64x128xbf16> to vector<64x128xbf16>
    %63 = vector.shape_cast %60 : vector<64x128xbf16> to vector<1x64x128xbf16>
    tpu.vector_store %arg5[%c0_52, %c0_53, %c0_54], %63 {strides = array<i32>} : memref<1x64x128xbf16, #tpu.memory_space<vmem>>, vector<1x64x128xbf16>,
    return
  }
  func.func @transform_0(%arg0: i32, %arg1: i32) -> (i32, i32, i32, i32) {
    %c0_i32 = arith.constant 0 : i32
    %c0_i32_0 = arith.constant 0 : i32
    %c0_i32_1 = arith.constant 0 : i32
    %c0_i32_2 = arith.constant 0 : i32
    return %arg0, %c0_i32, %c0_i32_0, %c0_i32_1 : i32, i32, i32, i32
  }
  func.func @transform_1(%arg0: i32, %arg1: i32) -> (i32, i32) {
    %c0_i32 = arith.constant 0 : i32
    %c0_i32_0 = arith.constant 0 : i32
    return %c0_i32, %arg1 : i32, i32
  }
  func.func @transform_2(%arg0: i32, %arg1: i32) -> (i32, i32) {
    %c0_i32 = arith.constant 0 : i32
    %c0_i32_0 = arith.constant 0 : i32
    return %c0_i32, %arg1 : i32, i32
  }
  func.func @transform_3(%arg0: i32, %arg1: i32) -> (i32, i32, i32) {
    %c0_i32 = arith.constant 0 : i32
    %c0_i32_0 = arith.constant 0 : i32
    return %arg0, %c0_i32, %arg1 : i32, i32, i32
  }
}

</mosaic_0001>

<bundles_post_ra>
// kernel: tpu_custom_call.1
= control target key start
LH: loop header
LB: loop body
LE: loop exit
PB: predicated region body
PF: predicated region fallthrough
CT: control target
= control target key end

     0   :  { %8 = vsyncpa [#allocation3], 0  ;;  %s2661_s0 = inlined_call_operand.vmem [shape: bf16[2,36,9,8], index: 0, kind: input, shape index: {}]   ;;  %s2662_s1 = inlined_call_operand.vmem [shape: bf16[72,128], index: 1, kind: input, shape index: {}]   ;;  %s2663_s2 = inlined_call_operand.vmem [shape: f32[1,128], index: 2, kind: input, shape index: {}]   ;;  %s2664_s3 = inlined_call_operand.hbm [shape: bf16[2,64,128], index: 3, kind: output, shape index: {}]  }
   0x1   :  { %10 = vsyncpa [#allocation3 + $0x1], 0  ;;  %s2304_s12 = smov 0   ;;  %s2306_s13 = smov 0  }
   0x2   :  { %s2308_s14 = smov 0   ;;  %s2310_s15 = smov 0  }
   0x3   :  { %s2312_s16 = smov 0   ;;  %s2314_s17 = smov 0  }
   0x4 LB: > { %s1775_s18 = sadd.s32 4294967295, %s2279_s17   ;;  %s1776_s19 = sadd.s32 4294967294, %s2279_s17   ;;  %s2279_s17 = sphi %s2314_s17, %s16_s17   ;;  %s2275_s16 = sphi %s2312_s16, %s2673_s16   ;;  %s2271_s15 = sphi %s2310_s15, %s2672_s15   ;;  %s2267_s14 = sphi %s2308_s14, %s2671_s14   ;;  %s2263_s13 = sphi %s2306_s13, %s2670_s13   ;;  %s2259_s12 = sphi %s2304_s12, %s2669_s12  }
   0x5   : > { %s28_s20 = sadd.s32 1, %s2275_s16  ;;  %s115_s21 = sadd.s32 1, %s2267_s14 }
   0x6   : > { %p30_p0 = scmp.ge.s32.totalorder %s28_s20, 2  ;;  %p125_p1 = scmp.ne.s32.totalorder %s2267_s14, %s2263_s13 }
   0x7   : > { %p126_p2 = scmp.eq.s32.totalorder %s1775_s18, 1  ;;  %p131_p3 = scmp.ne.s32.totalorder %s2263_s13, %s2259_s12 }
   0x8   : > { %s2675_s20 = smov (%p30_p0, %s28_s20), 0  ;;  %p132_p5 = scmp.eq.s32.totalorder %s1776_s19, 1 }
   0x9   : > { %p2344_p4 = por %p126_p2, %p125_p1  ;;  %s110_s23 = ssub.s32 %s2275_s16, %s2675_s20 }
   0xa   : > { %p1781_p6 = scmp.ge.s32.totalorder %s2279_s17, 1  ;;  %p113_p7 = scmp.eq.s32.totalorder %s110_s23, 0 }
   0xb   : > { %p2351_p8 = por %p132_p5, %p131_p3  ;;  %p171_p9 = scmp.lt.s32.totalorder %s2279_s17, 3 }
   0xc   : > { %s2357_s25 = scalar_select %p113_p7, %s2267_s14, %s115_s21  }
   0xd   : > { %p172_p10 = pnand %p1781_p6, %p171_p9 }
   0xe   : > { %p202_p11 = scmp.lt.s32.totalorder (!%p172_p10), %s2271_s15, 1  ;;  %s199_s7 = sand.u32 (!%p172_p10), 1, %s2263_s13  }
   0xf   : > { %175 = sbr.rel (%p172_p10) target bundleno = 323 (0x143), region = 32  ;;  %s1782_s8 = sshll.u32 (!%p172_p10), %s199_s7, 5 }
  0x10   : > { %s1950_s11 = sshll.u32 (!%p172_p10), %s2271_s15, 9  ;;  %s2616_s23 = scalar_lea.sflag (!%p172_p10), [#allocation3], %s199_s7 }
  0x11   : > { %s2610_s21 = scalar_lea.hbm (!%p172_p10), %s2664_s3, %s1950_s11  ;;  %s2281_s26 = smov (!%p172_p10), [#allocation2]  }
  0x12   : > { %s2207_s27 = sshll.u32 (!%p172_p10), %s2281_s26, 4  ;;  %s2208_s27 = int_to_ptr.vmem [resolvable:$false] %s2207_s27 }
  0x13   : > { %s2209_s28 = scalar_lea.vmem (!%p172_p10), %s2208_s27, 1024 }
  0x14   : > { %v233_v0 = vld [vmem:[%s2662_s1 + $0x4] sm:$0xf]  ;;  %vm267_vm0 = vcmask 1043456   ;;  %v223_v2 = vld [vmem:[%s2662_s1] sm:$0xf]  ;;  %s203_s5 = scalar_select %p202_p11, %s2271_s15, 1 }
  0x15   : > { %2112 = vmatprep.subr.msk.bf16.mxu1 %vm267_vm0, %v233_v0  ;;  %2111 = vmatprep.subr.msk.bf16.mxu0 %vm267_vm0, %v233_v0  ;;  %v269_v1 = vsel %vm267_vm0, %v233_v0, 0  ;;  %v567_v3 = vld [vmem:[%s2662_s1 + $0x8] sm:$0xf]  ;;  %vm254_vm1 = vcmask 64512   ;;  %v369_v4 = vsel %vm267_vm0, %v223_v2, 0 }
  0x16   : > { %2110 = vmatpush3.bf16.msra.mxu1 %v269_v1  ;;  %2020 = vmatpush3.bf16.msra.mxu0 %v269_v1  ;;  %s2121_s6 = smul.u32 288, %s203_s5  ;;  %v593_v5 = vsel %vm267_vm0, %v567_v3, 0  ;;  %v677_v7 = vld [vmem:[%s2662_s1 + $0xc] sm:$0xf]  ;;  %v795_v8 = vld [vmem:[%s2662_s1 + $0x10] sm:$0xf] }
  0x17   : > { %2113 = vmatprep.subr.msk.bf16.mxu1 %vm267_vm0, %v223_v2  ;;  %2114 = vmatprep.subr.msk.bf16.mxu0 %vm267_vm0, %v567_v3  ;;  %vm452_vm2 = vsmask.f32 3328  ;;  %vm453_vm3 = vsmask.f32 7440  ;;  %v711_v13 = vsel %vm267_vm0, %v677_v7, 0  ;;  %v2399_v14 = vsel %vm267_vm0, %v795_v8, 0 }
  0x18   : > { %s2378_s9 = scalar_lea.vmem %s2661_s0, %s2121_s6  ;;  %v2416_v38 = vld [vmem:[%s2662_s1 + $0x14] sm:$0xf]  ;;  %vm2420_vm4 = vmor %vm452_vm2, %vm453_vm3 }
  0x19   : > { %v2179_v6 = vld [vmem:[%s2378_s9 + $0x48] ss:$8 sps:$4 sm:$0xff]   ;;  %v2181_v10 = vld [vmem:[%s2378_s9 + $0x58] ss:$8 sps:$4 sm:$0xff]   ;;  %v437_v16 = vld [vmem:[%s2378_s9 + $0x4] sm:$0x1] }
  0x1a   : > { %v2180_v9 = vld [vmem:[%s2378_s9 + $0x68] ss:$8 sps:$4 sm:$0xff]   ;;  %2021 = vmatprep.mubr.msk.bf16.mxu0 %vm254_vm1, %v2179_v6  ;;  %v2182_v11 = vld [vmem:[%s2378_s9 + $0x78] ss:$8 sps:$4 sm:$0xff]   ;;  %v439_v19 = vld [vmem:[%s2378_s9 + $0xc] sm:$0x1] }
  0x1b   : > { %2025 = vmatprep.mubr.msk.bf16.mxu1 %vm254_vm1, %v2180_v9  ;;  %2022 = vmatmul.mubr.msk.bf16.vlgmr.msra.gmra.mxu0 %vm254_vm1, %v2181_v10  ;;  %v2183_v12 = vld [vmem:[%s2378_s9] ss:$8 sps:$4 sm:$0xff]   ;;  %v2184_v18 = vld [vmem:[%s2378_s9 + $0x10] ss:$8 sps:$4 sm:$0xff]   ;;  %v465_v22 = vshll.u32 %v437_v16, 16  ;;  %v479_v25 = vshll.u32 %v439_v19, 16 }
  0x1c   : > { %2026 = vmatmul.mubr.msk.bf16.vlgmr.msra.gmra.mxu1 %vm254_vm1, %v2182_v11  ;;  %2040 = vmatpush3.bf16.msra.mxu0 %v593_v5  ;;  %v436_v15 = vld [vmem:[%s2378_s9] sm:$0xf]  ;;  %v438_v17 = vld [vmem:[%s2378_s9 + $0x8] sm:$0xf]  ;;  %v440_v26 = vld [vmem:[%s2378_s9 + $0x10] sm:$0xf] }
  0x1d   : > { %2030 = vmatpush3.bf16.msra.mxu1 %v369_v4  ;;  %2031 = vmatprep.mubr.msk.bf16.mxu1 %vm254_vm1, %v2183_v12  ;;  %v456_v20 = vshrl.u32 %v436_v15, 16  ;;  %v459_v21 = vshll.u32 %v436_v15, 16  ;;  %v470_v23 = vshrl.u32 %v438_v17, 16  ;;  %v473_v24 = vshll.u32 %v438_v17, 16  ;;  %v441_v27 = vld [vmem:[%s2378_s9 + $0x14] sm:$0x1] }
  0x1e   : > { %2115 = vmatprep.subr.msk.bf16.mxu1 %vm267_vm0, %v677_v7  ;;  %2116 = vmatprep.subr.msk.bf16.mxu0 %vm267_vm0, %v795_v8  ;;  %v467_v30 = vrot.slane %v465_v22, 5  ;;  %v442_v32 = vld [vmem:[%s2378_s9 + $0x18] sm:$0xf]  ;;  %v481_v34 = vrot.slane %v479_v25, 5  ;;  %v443_v35 = vld [vmem:[%s2378_s9 + $0x1c] sm:$0x1] }
  0x1f   : > { %v458_v28 = vrot.slane %v456_v20, 4  ;;  %v461_v29 = vrot.slane %v459_v21, 5  ;;  %v472_v31 = vrot.slane %v470_v23, 4  ;;  %v475_v33 = vrot.slane %v473_v24, 5  ;;  %v2185_v52 = vld [vmem:[%s2378_s9 + $0x20] ss:$8 sps:$4 sm:$0xff]  }
  0x20   : > { %v484_v36 = vshrl.u32 %v440_v26, 16  ;;  %v487_v37 = vshll.u32 %v440_v26, 16  ;;  %v493_v40 = vshll.u32 %v441_v27, 16  ;;  %v498_v41 = vshrl.u32 %v442_v32, 16  ;;  %v2186_v58 = vld [vmem:[%s2378_s9 + $0x30] ss:$8 sps:$4 sm:$0xff]  }
  0x21   : > { %v462_v39 = vor.u32 %v461_v29, %v458_v28  ;;  %v501_v42 = vshll.u32 %v442_v32, 16  ;;  %v476_v44 = vor.u32 %v475_v33, %v472_v31  ;;  %v507_v47 = vshll.u32 %v443_v35, 16  ;;  %v444_v59 = vld [vmem:[%s2378_s9 + $0x20] sm:$0xf]  ;;  %v445_v60 = vld [vmem:[%s2378_s9 + $0x24] sm:$0x1] }
  0x22   : > { %v486_v45 = vrot.slane %v484_v36, 4  ;;  %v489_v46 = vrot.slane %v487_v37, 5  ;;  %v495_v49 = vrot.slane %v493_v40, 5  ;;  %v500_v50 = vrot.slane %v498_v41, 4  ;;  %v446_v63 = vld [vmem:[%s2378_s9 + $0x28] sm:$0xf] }
  0x23   : > { %v463_v48 = vrot.slane %v462_v39, 4  ;;  %v503_v51 = vrot.slane %v501_v42, 5  ;;  %v477_v53 = vrot.slane %v476_v44, 4  ;;  %v509_v55 = vrot.slane %v507_v47, 5  ;;  %v447_v0 = vld [vmem:[%s2378_s9 + $0x2c] sm:$0x1] }
  0x24   : > { %2032 = vmatmul.mubr.msk.bf16.vlgmr.msra.gmra.mxu1 %vm254_vm1, %v2184_v18  ;;  %v490_v54 = vor.u32 %v489_v46, %v486_v45  ;;  %v512_v1 = vshrl.u32 %v444_v59, 16  ;;  %v515_v4 = vshll.u32 %v444_v59, 16  ;;  %v521_v5 = vshll.u32 %v445_v60, 16  ;;  %v448_v6 = vld [vmem:[%s2378_s9 + $0x30] sm:$0xf] }
  0x25   : > { %2050 = vmatpush3.bf16.msra.mxu1 %v711_v13  ;;  %v468_v56 = vsel %vm2420_vm4, %v463_v48, %v467_v30  ;;  %v504_v57 = vor.u32 %v503_v51, %v500_v50  ;;  %2035 = vmatprep.mubr.msk.bf16.mxu1 %vm254_vm1, %v2185_v52  ;;  %v482_v61 = vsel %vm2420_vm4, %v477_v53, %v481_v34  ;;  %v526_v9 = vshrl.u32 %v446_v63, 16  ;;  %v449_v11 = vld [vmem:[%s2378_s9 + $0x34] sm:$0x1]  ;;  %v450_v17 = vld [vmem:[%s2378_s9 + $0x38] sm:$0xf] }
  0x26   : > { %2117 = vmatprep.subr.msk.bf16.mxu1 %vm267_vm0, %v2416_v38  ;;  %v491_v62 = vrot.slane %v490_v54, 4  ;;  %v1808_v2 = vcombine.low %v468_v56, %v482_v61  ;;  %v514_v8 = vrot.slane %v512_v1, 4  ;;  %v529_v10 = vshll.u32 %v446_v63, 16  ;;  %v1142_v18 = vld [vmem:[%s2662_s1 + $0x18] sm:$0xf] }
  0x27   : > { %v505_v3 = vrot.slane %v504_v57, 4  ;;  %v517_v13 = vrot.slane %v515_v4, 5  ;;  %v523_v15 = vrot.slane %v521_v5, 5  ;;  %v535_v16 = vshll.u32 %v447_v0, 16  ;;  %v451_v22 = vld [vmem:[%s2378_s9 + $0x3c] sm:$0x1] }
  0x28   : > { %v496_v7 = vsel %vm2420_vm4, %v491_v62, %v495_v49  ;;  %2041 = vmatprep.mubr.msk.bf16.mxu0 %vm254_vm1, %v1808_v2  ;;  %v528_v20 = vrot.slane %v526_v9, 4  ;;  %v531_v21 = vrot.slane %v529_v10, 5  ;;  %v540_v23 = vshrl.u32 %v448_v6, 16  ;;  %v2187_v35 = vld [vmem:[%s2378_s9 + $0x90] ss:$8 sps:$4 sm:$0xff]  }
  0x29   : > { %v510_v12 = vsel %vm2420_vm4, %v505_v3, %v509_v55  ;;  %v518_v24 = vor.u32 %v517_v13, %v514_v8  ;;  %v537_v25 = vrot.slane %v535_v16, 5  ;;  %v543_v26 = vshll.u32 %v448_v6, 16  ;;  %v2188_v44 = vld [vmem:[%s2378_s9 + $0xa0] ss:$8 sps:$4 sm:$0xff]   ;;  %v1260_v51 = vld [vmem:[%s2662_s1 + $0x1c] sm:$0xf] }
  0x2a   : > { %v1809_v19 = vcombine.low %v496_v7, %v510_v12  ;;  %v549_v27 = vshll.u32 %v449_v11, 16  ;;  %v532_v28 = vor.u32 %v531_v21, %v528_v20  ;;  %v542_v29 = vrot.slane %v540_v23, 4  ;;  %v2191_v53 = vld [vmem:[%s2378_s9 + $0xb0] ss:$8 sps:$4 sm:$0xff]   ;;  %v2192_v57 = vld [vmem:[%s2378_s9 + $0xc0] ss:$8 sps:$4 sm:$0xff]  }
  0x2b   : > { %v554_v30 = vshrl.u32 %v450_v17, 16  ;;  %v557_v31 = vshll.u32 %v450_v17, 16  ;;  %v519_v32 = vrot.slane %v518_v24, 4  ;;  %v545_v33 = vrot.slane %v543_v26, 5  ;;  %v1849_v59 = vld [vmem:[%s2378_s9 + $0x94] sm:$0x1] }
  0x2c   : > { %2036 = vmatmul.mubr.msk.bf16.gmra.mxu1 %vm254_vm1, %v2186_v58  ;;  %2042 = vmatmul.mubr.msk.bf16.vlgmr.msra.gmra.mxu0 %vm254_vm1, %v1809_v19  ;;  %v563_v34 = vshll.u32 %v451_v22, 16  ;;  %v533_v36 = vrot.slane %v532_v28, 4  ;;  %v551_v42 = vrot.slane %v549_v27, 5  ;;  %v1058_v49 = vsel %vm267_vm0, %v2416_v38, 0  ;;  %v2189_v38 = vld [vmem:[%s2378_s9 + $0xd8] ss:$8 sps:$4 sm:$0xff]  }
  0x2d   : > { %2060 = vmatpush3.bf16.msra.mxu0 %v2399_v14  ;;  %v556_v37 = vrot.slane %v554_v30, 4  ;;  %v559_v39 = vrot.slane %v557_v31, 5  ;;  %v524_v40 = vsel %vm2420_vm4, %v519_v32, %v523_v15  ;;  %v546_v41 = vor.u32 %v545_v33, %v542_v29  ;;  %2051 = vmatprep.mubr.msk.bf16.mxu1 %vm254_vm1, %v2187_v35  ;;  %v1848_v58 = vld [vmem:[%s2378_s9 + $0x90] sm:$0xf]  ;;  %v1850_v60 = vld [vmem:[%s2378_s9 + $0x98] sm:$0xf] }
  0x2e   : > { %2118 = vmatprep.subr.msk.bf16.mxu0 %vm267_vm0, %v1142_v18  ;;  %v538_v14 = vsel %vm2420_vm4, %v533_v36, %v537_v25  ;;  %v565_v46 = vrot.slane %v563_v34, 5  ;;  %v1176_v56 = vsel %vm267_vm0, %v1142_v18, 0  ;;  %v1851_v61 = vld [vmem:[%s2378_s9 + $0x9c] sm:$0x1]  ;;  %v921_v62 = vshrl.u32 %v1848_v58, 16 }
  0x2f   : > { %v560_v45 = vor.u32 %v559_v39, %v556_v37  ;;  %v1810_v47 = vcombine.low %v524_v40, %v538_v14  ;;  %v547_v48 = vrot.slane %v546_v41, 4  ;;  %v924_v63 = vshll.u32 %v1848_v58, 16  ;;  %v1852_v2 = vld [vmem:[%s2378_s9 + $0xa0] sm:$0xf]  ;;  %v2190_v3 = vld [vmem:[%s2378_s9 + $0xe8] ss:$8 sps:$4 sm:$0xff]  }
  0x30   : > { %v930_v0 = vshll.u32 %v1849_v59, 16  ;;  %v935_v1 = vshrl.u32 %v1850_v60, 16  ;;  %v938_v4 = vshll.u32 %v1850_v60, 16  ;;  %v944_v5 = vshll.u32 %v1851_v61, 16  ;;  %v1853_v6 = vld [vmem:[%s2378_s9 + $0xa4] sm:$0x1] }
  0x31   : > { %v561_v50 = vrot.slane %v560_v45, 4  ;;  %2045 = vmatprep.mubr.msk.bf16.mxu0 %vm254_vm1, %v1810_v47  ;;  %v552_v52 = vsel %vm2420_vm4, %v547_v48, %v551_v42  ;;  %v1854_v7 = vld [vmem:[%s2378_s9 + $0xa8] sm:$0xf]  ;;  %v2193_v8 = vld [vmem:[%s2378_s9 + $0xf8] ss:$8 sps:$4 sm:$0xff]   ;;  %v923_v9 = vrot.slane %v921_v62, 4 }
  0x32   : > { %v926_v10 = vrot.slane %v924_v63, 5  ;;  %v932_v11 = vrot.slane %v930_v0, 5  ;;  %v937_v12 = vrot.slane %v935_v1, 4  ;;  %v1855_v13 = vld [vmem:[%s2378_s9 + $0xac] sm:$0x1]  ;;  %v940_v15 = vrot.slane %v938_v4, 5 }
  0x33   : > { %v566_v54 = vsel %vm2420_vm4, %v561_v50, %v565_v46  ;;  %v946_v16 = vrot.slane %v944_v5, 5  ;;  %v949_v17 = vshrl.u32 %v1852_v2, 16  ;;  %v952_v18 = vshll.u32 %v1852_v2, 16  ;;  %v2494_v27 = vld [vmem:[%s2662_s1 + $0x20] sm:$0xf] }
  0x34   : > { %2052 = vmatmul.mubr.msk.bf16.vlgmr.msra.gmra.mxu1 %vm254_vm1, %v2188_v44  ;;  %v1811_v55 = vcombine.low %v552_v52, %v566_v54  ;;  %v927_v19 = vor.u32 %v926_v10, %v923_v9  ;;  %v958_v20 = vshll.u32 %v1853_v6, 16  ;;  %v963_v21 = vshrl.u32 %v1854_v7, 16  ;;  %v1856_v39 = vld [vmem:[%s2378_s9 + $0xb0] sm:$0xf]  ;;  %v1857_v40 = vld [vmem:[%s2378_s9 + $0xb4] sm:$0x1] }
  0x35   : > { %2070 = vmatpush3.bf16.msra.mxu1 %v1058_v49  ;;  %2055 = vmatprep.mubr.msk.bf16.mxu1 %vm254_vm1, %v2191_v53  ;;  %v966_v22 = vshll.u32 %v1854_v7, 16  ;;  %v941_v23 = vor.u32 %v940_v15, %v937_v12  ;;  %v951_v24 = vrot.slane %v949_v17, 4  ;;  %v954_v25 = vrot.slane %v952_v18, 5  ;;  %v1858_v41 = vld [vmem:[%s2378_s9 + $0xb8] sm:$0xf] }
  0x36   : > { %2119 = vmatprep.subr.msk.bf16.mxu1 %vm267_vm0, %v1260_v51  ;;  %2046 = vmatmul.mubr.msk.bf16.gmra.mxu0 %vm254_vm1, %v1811_v55  ;;  %v972_v26 = vshll.u32 %v1855_v13, 16  ;;  %v928_v28 = vrot.slane %v927_v19, 4  ;;  %v965_v29 = vrot.slane %v963_v21, 4  ;;  %v1294_v31 = vsel %vm267_vm0, %v1260_v51, 0  ;;  %v2194_v42 = vld [vmem:[%s2378_s9 + $0x108] ss:$8 sps:$4 sm:$0xff]  }
  0x37   : > { %2061 = vmatprep.mubr.msk.bf16.mxu0 %vm254_vm1, %v2189_v38  ;;  %v968_v30 = vrot.slane %v966_v22, 5  ;;  %v942_v32 = vrot.slane %v941_v23, 4  ;;  %v955_v33 = vor.u32 %v954_v25, %v951_v24  ;;  %v960_v34 = vrot.slane %v958_v20, 5  ;;  %v1859_v45 = vld [vmem:[%s2378_s9 + $0xbc] sm:$0x1] }
  0x38   : > { %v974_v35 = vrot.slane %v972_v26, 5  ;;  %v933_v36 = vsel %vm2420_vm4, %v928_v28, %v932_v11  ;;  %v977_v46 = vshrl.u32 %v1856_v39, 16  ;;  %v980_v47 = vshll.u32 %v1856_v39, 16  ;;  %v2195_v50 = vld [vmem:[%s2378_s9 + $0x8] ss:$8 sps:$4 sm:$0xff]  }
  0x39   : > { %v969_v37 = vor.u32 %v968_v30, %v965_v29  ;;  %v947_v44 = vsel %vm2420_vm4, %v942_v32, %v946_v16  ;;  %v956_v14 = vrot.slane %v955_v33, 4  ;;  %v986_v51 = vshll.u32 %v1857_v40, 16  ;;  %v1860_v53 = vld [vmem:[%s2378_s9 + $0xc0] sm:$0xf]  ;;  %v1862_v62 = vld [vmem:[%s2378_s9 + $0xc8] sm:$0xf] }
  0x3a   : > { %v1864_v48 = vcombine.low %v933_v36, %v947_v44  ;;  %v991_v52 = vshrl.u32 %v1858_v41, 16  ;;  %v979_v38 = vrot.slane %v977_v46, 4  ;;  %v982_v55 = vrot.slane %v980_v47, 5  ;;  %v1863_v2 = vld [vmem:[%s2378_s9 + $0xcc] sm:$0x1] }
  0x3b   : > { %v970_v49 = vrot.slane %v969_v37, 4  ;;  %v961_v54 = vsel %vm2420_vm4, %v956_v14, %v960_v34  ;;  %v988_v59 = vrot.slane %v986_v51, 5  ;;  %v1000_v61 = vshll.u32 %v1859_v45, 16  ;;  %v2196_v16 = vld [vmem:[%s2378_s9 + $0x18] ss:$8 sps:$4 sm:$0xff]  }
  0x3c   : > { %2056 = vmatmul.mubr.msk.bf16.gmra.mxu1 %vm254_vm1, %v2192_v57  ;;  %v1861_v57 = vld [vmem:[%s2378_s9 + $0xc4] sm:$0x1]  ;;  %v993_v60 = vrot.slane %v991_v52, 4  ;;  %v983_v0 = vor.u32 %v982_v55, %v979_v38  ;;  %v1008_v5 = vshll.u32 %v1860_v53, 16  ;;  %v1019_v7 = vshrl.u32 %v1862_v62, 16 }
  0x3d   : > { %2071 = vmatprep.mubr.msk.bf16.mxu1 %vm254_vm1, %v1864_v48  ;;  %v975_v58 = vsel %vm2420_vm4, %v970_v49, %v974_v35  ;;  %v1002_v4 = vrot.slane %v1000_v61, 5  ;;  %v1014_v6 = vshll.u32 %v1861_v57, 16  ;;  %v1022_v11 = vshll.u32 %v1862_v62, 16  ;;  %v2197_v29 = vld [vmem:[%s2378_s9 + $0x28] ss:$8 sps:$4 sm:$0xff]  }
  0x3e   : > { %2062 = vmatmul.mubr.msk.bf16.vlgmr.msra.gmra.mxu0 %vm254_vm1, %v2190_v3  ;;  %v1865_v63 = vcombine.low %v961_v54, %v975_v58  ;;  %v1005_v3 = vshrl.u32 %v1860_v53, 16  ;;  %v1010_v12 = vrot.slane %v1008_v5, 5  ;;  %v1021_v13 = vrot.slane %v1019_v7, 4  ;;  %v1904_v30 = vld [vmem:[%s2378_s9 + $0x8] sm:$0xf] }
  0x3f   : > { %2080 = vmatpush3.bf16.msra.mxu0 %v1176_v56  ;;  %2065 = vmatprep.mubr.msk.bf16.mxu0 %vm254_vm1, %v2193_v8  ;;  %v994_v56 = vshll.u32 %v1858_v41, 16  ;;  %v984_v8 = vrot.slane %v983_v0, 4  ;;  %v1028_v15 = vshll.u32 %v1863_v2, 16  ;;  %v1024_v19 = vrot.slane %v1022_v11, 5  ;;  %v2199_v32 = vld [vmem:[%s2378_s9 + $0x50] ss:$8 sps:$4 sm:$0xff]  }
  0x40   : > { %2120 = vmatprep.subr.msk.bf16.mxu0 %vm267_vm0, %v2494_v27  ;;  %v1007_v10 = vrot.slane %v1005_v3, 4  ;;  %v1016_v21 = vrot.slane %v1014_v6, 5  ;;  %v1523_v25 = vsel %vm267_vm0, %v2494_v27, 0  ;;  %v1905_v33 = vld [vmem:[%s2378_s9 + $0xc] sm:$0x1]  ;;  %v1386_v35 = vshrl.u32 %v1904_v30, 16 }
  0x41   : > { %v996_v1 = vrot.slane %v994_v56, 5  ;;  %v989_v17 = vsel %vm2420_vm4, %v984_v8, %v988_v59  ;;  %v1025_v23 = vor.u32 %v1024_v19, %v1021_v13  ;;  %v1030_v24 = vrot.slane %v1028_v15, 5  ;;  %v1906_v34 = vld [vmem:[%s2378_s9 + $0x10] sm:$0xf]  ;;  %v1907_v37 = vld [vmem:[%s2378_s9 + $0x14] sm:$0x1] }
  0x42   : > { %v1011_v20 = vor.u32 %v1010_v12, %v1007_v10  ;;  %v1389_v39 = vshll.u32 %v1904_v30, 16  ;;  %v1395_v27 = vshll.u32 %v1905_v33, 16  ;;  %v1400_v40 = vshrl.u32 %v1906_v34, 16  ;;  %v1908_v45 = vld [vmem:[%s2378_s9 + $0x18] sm:$0xf] }
  0x43   : > { %v997_v9 = vor.u32 %v996_v1, %v993_v60  ;;  %v1403_v44 = vshll.u32 %v1906_v34, 16  ;;  %v1409_v14 = vshll.u32 %v1907_v37, 16  ;;  %v2198_v51 = vld [vmem:[%s2378_s9 + $0x38] ss:$8 sps:$4 sm:$0xff]   ;;  %v1911_v38 = vld [vmem:[%s2378_s9 + $0x24] sm:$0x1] }
  0x44   : > { %2072 = vmatmul.mubr.msk.bf16.vlgmr.msra.gmra.mxu1 %vm254_vm1, %v1865_v63  ;;  %v1012_v28 = vrot.slane %v1011_v20, 4  ;;  %v1391_v47 = vrot.slane %v1389_v39, 5  ;;  %v1397_v48 = vrot.slane %v1395_v27, 5  ;;  %v1402_v49 = vrot.slane %v1400_v40, 4  ;;  %v1910_v54 = vld [vmem:[%s2378_s9 + $0x20] sm:$0xf] }
  0x45   : > { %2090 = vmatpush3.bf16.msra.mxu1 %v1294_v31  ;;  %v998_v18 = vrot.slane %v997_v9, 4  ;;  %v1026_v31 = vrot.slane %v1025_v23, 4  ;;  %v1405_v52 = vrot.slane %v1403_v44, 5  ;;  %v1411_v53 = vrot.slane %v1409_v14, 5  ;;  %v2200_v63 = vld [vmem:[%s2378_s9 + $0x60] ss:$8 sps:$4 sm:$0xff]  }
  0x46   : > { %2066 = vmatmul.mubr.msk.bf16.gmra.mxu0 %vm254_vm1, %v2194_v42  ;;  %v1017_v36 = vsel %vm2420_vm4, %v1012_v28, %v1016_v21  ;;  %v1388_v42 = vrot.slane %v1386_v35, 4  ;;  %v1414_v56 = vshrl.u32 %v1908_v45, 16  ;;  %v1417_v57 = vshll.u32 %v1908_v45, 16  ;;  %v2201_v6 = vld [vmem:[%s2378_s9 + $0x70] ss:$8 sps:$4 sm:$0xff]  }
  0x47   : > { %2081 = vmatprep.mubr.msk.bf16.mxu0 %vm254_vm1, %v2195_v50  ;;  %v1003_v22 = vsel %vm2420_vm4, %v998_v18, %v1002_v4  ;;  %v1031_v41 = vsel %vm2420_vm4, %v1026_v31, %v1030_v24  ;;  %v1909_v50 = vld [vmem:[%s2378_s9 + $0x1c] sm:$0x1]  ;;  %v1406_v59 = vor.u32 %v1405_v52, %v1402_v49  ;;  %v1428_v60 = vshrl.u32 %v1910_v54, 16  ;;  %v1912_v11 = vld [vmem:[%s2378_s9 + $0x28] sm:$0xf] }
  0x48   : > { %v1866_v26 = vcombine.low %v989_v17, %v1003_v22  ;;  %v1867_v46 = vcombine.low %v1017_v36, %v1031_v41  ;;  %v1392_v55 = vor.u32 %v1391_v47, %v1388_v42  ;;  %v1423_v58 = vshll.u32 %v1909_v50, 16  ;;  %v1913_v15 = vld [vmem:[%s2378_s9 + $0x2c] sm:$0x1]  ;;  %v1915_v17 = vld [vmem:[%s2378_s9 + $0x34] sm:$0x1] }
  0x49   : > { %v1431_v61 = vshll.u32 %v1910_v54, 16  ;;  %v1437_v62 = vshll.u32 %v1911_v38, 16  ;;  %v1416_v1 = vrot.slane %v1414_v56, 4  ;;  %v1419_v2 = vrot.slane %v1417_v57, 5  ;;  %v1916_v22 = vld [vmem:[%s2378_s9 + $0x38] sm:$0xf] }
  0x4a   : > { %2075 = vmatprep.mubr.msk.bf16.mxu1 %vm254_vm1, %v1866_v26  ;;  %v1393_v0 = vrot.slane %v1392_v55, 4  ;;  %v1407_v3 = vrot.slane %v1406_v59, 4  ;;  %v1430_v4 = vrot.slane %v1428_v60, 4  ;;  %v1425_v9 = vrot.slane %v1423_v58, 5  ;;  %v1917_v28 = vld [vmem:[%s2378_s9 + $0x3c] sm:$0x1] }
  0x4b   : > { %v1433_v5 = vrot.slane %v1431_v61, 5  ;;  %v1420_v8 = vor.u32 %v1419_v2, %v1416_v1  ;;  %v1439_v10 = vrot.slane %v1437_v62, 5  ;;  %v1442_v20 = vshrl.u32 %v1912_v11, 16  ;;  %v1918_v33 = vld [vmem:[%s2378_s9 + $0x40] sm:$0xf] }
  0x4c   : > { %2076 = vmatmul.mubr.msk.bf16.gmra.mxu1 %vm254_vm1, %v1867_v46  ;;  %v1398_v7 = vsel %vm2420_vm4, %v1393_v0, %v1397_v48  ;;  %v1412_v12 = vsel %vm2420_vm4, %v1407_v3, %v1411_v53  ;;  %v1445_v21 = vshll.u32 %v1912_v11, 16  ;;  %v1451_v24 = vshll.u32 %v1913_v15, 16  ;;  %v1919_v39 = vld [vmem:[%s2378_s9 + $0x44] sm:$0x1]  ;;  %v2202_v47 = vld [vmem:[%s2378_s9 + $0x80] ss:$8 sps:$4 sm:$0xff]  }
  0x4d   : > { %2091 = vmatprep.mubr.msk.bf16.mxu1 %vm254_vm1, %v2199_v32  ;;  %v1434_v13 = vor.u32 %v1433_v5, %v1430_v4  ;;  %v1920_v18 = vcombine.low %v1398_v7, %v1412_v12  ;;  %v1421_v19 = vrot.slane %v1420_v8, 4  ;;  %v1444_v30 = vrot.slane %v1442_v20, 4 }
  0x4e   : > { %2082 = vmatmul.mubr.msk.bf16.vlgmr.msra.gmra.mxu0 %vm254_vm1, %v2196_v16  ;;  %v1914_v16 = vld [vmem:[%s2378_s9 + $0x30] sm:$0xf]  ;;  %v1447_v31 = vrot.slane %v1445_v21, 5  ;;  %v1465_v32 = vshll.u32 %v1915_v17, 16  ;;  %v1453_v35 = vrot.slane %v1451_v24, 5  ;;  %v1470_v42 = vshrl.u32 %v1916_v22, 16 }
  0x4f   : > { %2100 = vmatpush3.bf16.msra.mxu0 %v1523_v25  ;;  %2085 = vmatprep.mubr.msk.bf16.mxu0 %vm254_vm1, %v2197_v29  ;;  %v1435_v23 = vrot.slane %v1434_v13, 4  ;;  %v1456_v25 = vshrl.u32 %v1914_v16, 16  ;;  %v1459_v26 = vshll.u32 %v1914_v16, 16  ;;  %v1426_v29 = vsel %vm2420_vm4, %v1421_v19, %v1425_v9  ;;  %s201_s9 = scalar_lea.vmem [#allocation2], %s1782_s8 }
  0x50   : > { %v1448_v40 = vor.u32 %v1447_v31, %v1444_v30  ;;  %v1467_v41 = vrot.slane %v1465_v32, 5  ;;  %v1473_v14 = vshll.u32 %v1916_v22, 16  ;;  %v1479_v45 = vshll.u32 %v1917_v28, 16  ;;  %s1676_s10 = sshll.u32 %s201_s9, 4  ;;  %s2612_s10 = int_to_ptr.vmem [resolvable:$true] %s1676_s10 }
  0x51   : > { %v1440_v34 = vsel %vm2420_vm4, %v1435_v23, %v1439_v10  ;;  %v1458_v36 = vrot.slane %v1456_v25, 4  ;;  %v1461_v37 = vrot.slane %v1459_v26, 5  ;;  %v1484_v46 = vshrl.u32 %v1918_v33, 16  ;;  %s2203_s15 = scalar_lea.vmem %s2612_s10, 512  ;;  %p2210_p1 = scmp.lt.s32.totalorder %s2612_s10, %s2208_s27 }
  0x52   : > { %v1921_v27 = vcombine.low %v1426_v29, %v1440_v34  ;;  %v1449_v48 = vrot.slane %v1448_v40, 4  ;;  %v1472_v49 = vrot.slane %v1470_v42, 4  ;;  %v1487_v50 = vshll.u32 %v1918_v33, 16  ;;  %p2204_p12 = scmp.ne.s32.totalorder %s2612_s10, %s2203_s15  ;;  %p2211_p2 = scmp.lt.s32.totalorder %s2209_s28, %s2203_s15 }
  0x53   : > { %v1462_v44 = vor.u32 %v1461_v37, %v1458_v36  ;;  %v1475_v53 = vrot.slane %v1473_v14, 5  ;;  %v1486_v54 = vrot.slane %v1484_v46, 4  ;;  %v1481_v58 = vrot.slane %v1479_v45, 5 }
  0x54   : > { %2092 = vmatmul.mubr.msk.bf16.vlgmr.msra.gmra.mxu1 %vm254_vm1, %v2200_v63  ;;  %v1454_v38 = vsel %vm2420_vm4, %v1449_v48, %v1453_v35  ;;  %v1489_v55 = vrot.slane %v1487_v50, 5  ;;  %p2205_p13 = pnand %p2204_p12, %p2344_p4  ;;  %p2212_p3 = por %p2211_p2, %p2210_p1 }
  0x55   : > { %2095 = vmatprep.mubr.msk.bf16.mxu1 %vm254_vm1, %v2201_v6  ;;  %v1463_v52 = vrot.slane %v1462_v44, 4  ;;  %v1476_v57 = vor.u32 %v1475_v53, %v1472_v49 }
  0x56   : > { %2086 = vmatmul.mubr.msk.bf16.gmra.mxu0 %vm254_vm1, %v2198_v51  ;;  %v1493_v51 = vshll.u32 %v1919_v39, 16  ;;  %v1490_v60 = vor.u32 %v1489_v55, %v1486_v54  ;;  %p2206_p0 = pneg %p2205_p13 }
  0x57   : > { %2101 = vmatprep.mubr.msk.bf16.mxu0 %vm254_vm1, %v1920_v18  ;;  %v1468_v56 = vsel %vm2420_vm4, %v1463_v52, %v1467_v41  ;;  %v1477_v62 = vrot.slane %v1476_v57, 4 }
  0x58   : > { %v1922_v59 = vcombine.low %v1454_v38, %v1468_v56  ;;  %v1495_v61 = vrot.slane %v1493_v51, 5  ;;  %v1491_v63 = vrot.slane %v1490_v60, 4  ;;  %p2213_p5 = pnand %p2212_p3, %p2206_p0 }
  0x59   : > { %v1482_v0 = vsel %vm2420_vm4, %v1477_v62, %v1481_v58 }
  0x5a   : > { %v1496_v1 = vsel %vm2420_vm4, %v1491_v63, %v1495_v61 }
  0x5b   : > { %v1923_v2 = vcombine.low %v1482_v0, %v1496_v1 }
  0x5c   : > { %2096 = vmatmul.mubr.msk.bf16.gmra.mxu1 %vm254_vm1, %v2202_v47 }
  0x5e   : > { %2102 = vmatmul.mubr.msk.bf16.vlgmr.msra.gmra.mxu0 %vm254_vm1, %v1921_v27 }
  0x5f   : > { %2105 = vmatprep.mubr.msk.bf16.mxu0 %vm254_vm1, %v1922_v59 }
  0x66   : > { %2106 = vmatmul.mubr.msk.bf16.gmra.mxu0 %vm254_vm1, %v1923_v2 }
  0xdb   : > { %v2023_v5 = vpop.f32.mrf.mxu0 }
  0xdc   : > { %v2027_v3 = vpop.f32.mrf.mxu1 }
  0xdd   : > { %v305_v8 = vpop.f32.mrf.mxu0 }
  0xde   : > { %v321_v4 = vpop.f32.mrf.mxu1 }
  0xdf   : > { %v2024_v11 = vpop.f32.mrf.mxu0 }
  0xe0   : > { %v2585_v6 = vpop.f32.mrf.mxu1 }
  0xe1   : > { %v308_v15 = vpop.f32.mrf.mxu0 }
  0xe2   : > { %v2587_v7 = vpop.f32.mrf.mxu1 }
  0xe4   : > { %v2033_v9 = vpop.f32.mrf.mxu1 }
  0xe5   : > { %v414_v14 = vadd.f32 %v2033_v9, %v2023_v5 }
  0xe6   : > { %v405_v10 = vpop.f32.mrf.mxu1 }
  0xe7   : > { %v406_v47 = vadd.f32 %v405_v10, %v305_v8 }
  0xe8   : > { %v2034_v12 = vpop.f32.mrf.mxu1 }
  0xe9   : > { %v417_v50 = vadd.f32 %v2034_v12, %v2024_v11 }
  0xea   : > { %v408_v13 = vpop.f32.mrf.mxu1 }
  0xeb   : > { %v409_v54 = vadd.f32 %v408_v13, %v308_v15 }
  0xec   : > { %v2037_v16 = vpop.f32.mrf.mxu1  ;;  %v2043_v43 = vpop.f32.mrf.mxu0 }
  0xed   : > { %v662_v49 = vadd.f32 %v2043_v43, %v414_v14  ;;  %v430_v61 = vadd.f32 %v2037_v16, %v2027_v3 }
  0xee   : > { %v421_v17 = vpop.f32.mrf.mxu1  ;;  %v629_v18 = vpop.f32.mrf.mxu0 }
  0xef   : > { %v660_v53 = vadd.f32 %v629_v18, %v406_v47  ;;  %v422_v1 = vadd.f32 %v421_v17, %v321_v4 }
  0xf0   : > { %v2038_v19 = vpop.f32.mrf.mxu1  ;;  %v2044_v20 = vpop.f32.mrf.mxu0 }
  0xf1   : > { %v663_v56 = vadd.f32 %v2044_v20, %v417_v50  ;;  %v433_v11 = vadd.f32 %v2038_v19, %v2585_v6 }
  0xf2   : > { %v424_v21 = vpop.f32.mrf.mxu1  ;;  %v632_v22 = vpop.f32.mrf.mxu0 }
  0xf3   : > { %v661_v60 = vadd.f32 %v632_v22, %v409_v54  ;;  %v425_v22 = vadd.f32 %v424_v21, %v2587_v7 }
  0xf4   : > { %v2053_v23 = vpop.f32.mrf.mxu1 }
  0xf5   : > { %v780_v38 = vadd.f32 %v2053_v23, %v662_v49 }
  0xf6   : > { %v747_v24 = vpop.f32.mrf.mxu1  ;;  %v2047_v25 = vpop.f32.mrf.mxu0 }
  0xf7   : > { %v778_v57 = vadd.f32 %v747_v24, %v660_v53  ;;  %v666_v13 = vadd.f32 %v2047_v25, %v430_v61 }
  0xf8   : > { %v2054_v26 = vpop.f32.mrf.mxu1  ;;  %v645_v28 = vpop.f32.mrf.mxu0 }
  0xf9   : > { %v781_v63 = vadd.f32 %v2054_v26, %v663_v56  ;;  %v664_v20 = vadd.f32 %v645_v28, %v422_v1 }
  0xfa   : > { %v750_v29 = vpop.f32.mrf.mxu1  ;;  %v2048_v30 = vpop.f32.mrf.mxu0 }
  0xfb   : > { %v779_v8 = vadd.f32 %v750_v29, %v661_v60  ;;  %v667_v26 = vadd.f32 %v2048_v30, %v433_v11 }
  0xfc   : > { %v2057_v31 = vpop.f32.mrf.mxu1  ;;  %v648_v32 = vpop.f32.mrf.mxu0 }
  0xfd   : > { %v784_v23 = vadd.f32 %v2057_v31, %v666_v13  ;;  %v665_v25 = vadd.f32 %v648_v32, %v425_v22  ;;  %v1928_v32 = vld [vmem:[%s2663_s2] ss:$0 sm:$0xff] }
  0xfe   : > { %v763_v33 = vpop.f32.mrf.mxu1  ;;  %v2063_v34 = vpop.f32.mrf.mxu0 }
  0xff   : > { %v898_v62 = vadd.f32 %v2063_v34, %v780_v38  ;;  %v782_v29 = vadd.f32 %v763_v33, %v664_v20 }
 0x100   : > { %v2058_v35 = vpop.f32.mrf.mxu1  ;;  %v865_v36 = vpop.f32.mrf.mxu0 }
 0x101   : > { %v896_v5 = vadd.f32 %v865_v36, %v778_v57 }
 0x102   : > { %v2064_v37 = vpop.f32.mrf.mxu0  ;;  %v2589_v39 = vpop.f32.mrf.mxu1 }
 0x103   : > { %v899_v15 = vadd.f32 %v2064_v37, %v781_v63  ;;  %v785_v37 = vadd.f32 %v2058_v35, %v667_v26  ;;  %v783_v31 = vadd.f32 %v2589_v39, %v665_v25 }
 0x104   : > { %v868_v27 = vpop.f32.mrf.mxu0  ;;  %v2073_v41 = vpop.f32.mrf.mxu1 }
 0x105   : > { %v1127_v9 = vadd.f32 %v2073_v41, %v898_v62  ;;  %v897_v16 = vadd.f32 %v868_v27, %v779_v8 }
 0x106   : > { %v2067_v40 = vpop.f32.mrf.mxu0  ;;  %v1094_v44 = vpop.f32.mrf.mxu1 }
 0x107   : > { %v1125_v43 = vadd.f32 %v1094_v44, %v896_v5  ;;  %v902_v14 = vadd.f32 %v2067_v40, %v784_v23 }
 0x108   : > { %v881_v42 = vpop.f32.mrf.mxu0  ;;  %v2074_v46 = vpop.f32.mrf.mxu1 }
 0x109   : > { %v1128_v4 = vadd.f32 %v2074_v46, %v899_v15  ;;  %v900_v21 = vadd.f32 %v881_v42, %v782_v29 }
 0x10a   : > { %v2591_v45 = vpop.f32.mrf.mxu0  ;;  %v1097_v51 = vpop.f32.mrf.mxu1 }
 0x10b   : > { %v1126_v41 = vadd.f32 %v1097_v51, %v897_v16  ;;  %v903_v51 = vadd.f32 %v2591_v45, %v785_v37 }
 0x10c   : > { %v2593_v48 = vpop.f32.mrf.mxu0  ;;  %v2077_v58 = vpop.f32.mrf.mxu1 }
 0x10d   : > { %v1131_v30 = vadd.f32 %v2077_v58, %v902_v14  ;;  %v901_v39 = vadd.f32 %v2593_v48, %v783_v31 }
 0x10e   : > { %v2083_v52 = vpop.f32.mrf.mxu0  ;;  %v1110_v0 = vpop.f32.mrf.mxu1 }
 0x10f   : > { %v1245_v24 = vadd.f32 %v2083_v52, %v1127_v9  ;;  %v1129_v40 = vadd.f32 %v1110_v0, %v900_v21 }
 0x110   : > { %v1212_v55 = vpop.f32.mrf.mxu0  ;;  %v2078_v10 = vpop.f32.mrf.mxu1 }
 0x111   : > { %v1243_v36 = vadd.f32 %v1212_v55, %v1125_v43  ;;  %v1132_v54 = vadd.f32 %v2078_v10, %v903_v51 }
 0x112   : > { %v2084_v59 = vpop.f32.mrf.mxu0  ;;  %v1113_v18 = vpop.f32.mrf.mxu1 }
 0x113   : > { %v1246_v28 = vadd.f32 %v2084_v59, %v1128_v4  ;;  %v1130_v45 = vadd.f32 %v1113_v18, %v901_v39 }
 0x114   : > { %v1215_v2 = vpop.f32.mrf.mxu0  ;;  %v2093_v17 = vpop.f32.mrf.mxu1 }
 0x115   : > { %v1363_v6 = vadd.f32 %v2093_v17, %v1245_v24  ;;  %v1244_v46 = vadd.f32 %v1215_v2, %v1126_v41 }
 0x116   : > { %v2087_v12 = vpop.f32.mrf.mxu0  ;;  %v1330_v19 = vpop.f32.mrf.mxu1 }
 0x117   : > { %v1361_v47 = vadd.f32 %v1330_v19, %v1243_v36  ;;  %v1249_v55 = vadd.f32 %v2087_v12, %v1131_v30 }
 0x118   : > { %v1228_v3 = vpop.f32.mrf.mxu0  ;;  %v2094_v7 = vpop.f32.mrf.mxu1 }
 0x119   : > { %v1364_v49 = vadd.f32 %v2094_v7, %v1246_v28  ;;  %v1247_v61 = vadd.f32 %v1228_v3, %v1129_v40 }
 0x11a   : > { %v2088_v34 = vpop.f32.mrf.mxu0  ;;  %v1333_v50 = vpop.f32.mrf.mxu1 }
 0x11b   : > { %v1362_v42 = vadd.f32 %v1333_v50, %v1244_v46  ;;  %v1250_v2 = vadd.f32 %v2088_v34, %v1132_v54 }
 0x11c   : > { %v1231_v44 = vpop.f32.mrf.mxu0  ;;  %v2097_v53 = vpop.f32.mrf.mxu1 }
 0x11d   : > { %v1367_v0 = vadd.f32 %v2097_v53, %v1249_v55  ;;  %v1248_v10 = vadd.f32 %v1231_v44, %v1130_v45 }
 0x11e   : > { %v2103_v27 = vpop.f32.mrf.mxu0  ;;  %v1346_v58 = vpop.f32.mrf.mxu1 }
 0x11f   : > { %v1592_v33 = vadd.f32 %v2103_v27, %v1363_v6  ;;  %v1365_v9 = vadd.f32 %v1346_v58, %v1247_v61 }
 0x120   : > { %v1559_v35 = vpop.f32.mrf.mxu0  ;;  %v2098_v1 = vpop.f32.mrf.mxu1 }
 0x121   : > { %v1590_v52 = vadd.f32 %v1559_v35, %v1361_v47  ;;  %v1607_v56 = vadd.f32 %v1928_v32, %v1592_v33  ;;  %v1368_v20 = vadd.f32 %v2098_v1, %v1250_v2 }
 0x122   : > { %v2104_v38 = vpop.f32.mrf.mxu0  ;;  %v1349_v13 = vpop.f32.mrf.mxu1 }
 0x123   : > { %v1593_v57 = vadd.f32 %v2104_v38, %v1364_v49  ;;  %v1605_v59 = vadd.f32 %v1928_v32, %v1590_v52  ;;  %v1615_v5 = vmax.f32 %v1607_v56, 0.0  ;;  %v1366_v23 = vadd.f32 %v1349_v13, %v1248_v10 }
 0x124   : > { %v1562_v60 = vpop.f32.mrf.mxu0 }
 0x125   : > { %v1608_v62 = vadd.f32 %v1928_v32, %v1593_v57  ;;  %v1591_v63 = vadd.f32 %v1562_v60, %v1362_v42  ;;  %v1613_v11 = vmax.f32 %v1605_v59, 0.0 }
 0x126   : > { %v2107_v12 = vpop.f32.mrf.mxu0 }
 0x127   : > { %v1616_v48 = vmax.f32 %v1608_v62, 0.0  ;;  %v1606_v8 = vadd.f32 %v1928_v32, %v1591_v63  ;;  %v1596_v18 = vadd.f32 %v2107_v12, %v1367_v0 }
 0x128   : > { %v1575_v22 = vpop.f32.mrf.mxu0 }
 0x129   : > { %v1959_v15 = vpack.c.bf16 %v1616_v48, %v1615_v5  ;;  %v1614_v43 = vmax.f32 %v1606_v8, 0.0  ;;  %v1594_v16 = vadd.f32 %v1575_v22, %v1365_v9  ;;  %v1611_v4 = vadd.f32 %v1928_v32, %v1596_v18 }
 0x12a   : > { %v2108_v24 = vpop.f32.mrf.mxu0 }
 0x12b   : > { %1971 = vst [vmem:[%s201_s9 + $0x8] sm:$0xff] %v1959_v15   ;;  %v1954_v3 = vpack.c.bf16 %v1614_v43, %v1613_v11  ;;  %v1597_v17 = vadd.f32 %v2108_v24, %v1368_v20  ;;  %v1609_v29 = vadd.f32 %v1928_v32, %v1594_v16  ;;  %v1619_v41 = vmax.f32 %v1611_v4, 0.0 }
 0x12c   : > { %v1578_v26 = vpop.f32.mrf.mxu0 }
 0x12d   : > { %1955 = vst [vmem:[%s201_s9] sm:$0xff] %v1954_v3   ;;  %v1612_v34 = vadd.f32 %v1928_v32, %v1597_v17  ;;  %v1595_v36 = vadd.f32 %v1578_v26, %v1366_v23  ;;  %v1617_v25 = vmax.f32 %v1609_v29, 0.0 }
 0x12f   : > { %v1620_v6 = vmax.f32 %v1612_v34, 0.0  ;;  %v1610_v19 = vadd.f32 %v1928_v32, %v1595_v36 }
 0x131   : > { %v1969_v37 = vpack.c.bf16 %v1620_v6, %v1619_v41  ;;  %v1618_v44 = vmax.f32 %v1610_v19, 0.0 }
 0x133   : > { %1973 = vst [vmem:[%s201_s9 + $0x18] sm:$0xff] %v1969_v37   ;;  %v1964_v14 = vpack.c.bf16 %v1618_v44, %v1617_v25 }
 0x135   : > { %1972 = vst [vmem:[%s201_s9 + $0x10] sm:$0xff] %v1964_v14  }
 0x136   : > { %2216 = shalt.err (!%p2213_p5)
}
 0x137   : > { %s2217_s29 = scalar_lea.hbm %s2610_s21, 512  ;;  %s2221_s5 = scalar_lea.hbm %s2664_s3, 1024 }
 0x138   : > { %p2218_p6 = scmp.ne.s32.totalorder %s2610_s21, %s2217_s29  ;;  %p2222_p10 = scmp.lt.s32.totalorder %s2610_s21, %s2664_s3 }
 0x139   : > { %p2223_p11 = scmp.lt.s32.totalorder %s2221_s5, %s2217_s29 }
 0x13a   : > { %p2219_p7 = pnand %p2218_p6, %p2344_p4 }
 0x13b   : > { %p2224_p12 = por %p2223_p11, %p2222_p10 }
 0x13c   : > { %p2220_p9 = pneg %p2219_p7 }
 0x13e   : > { %p2225_p13 = pnand %p2224_p12, %p2220_p9 }
 0x140   : > { %2228 = shalt.err (!%p2225_p13)
}
 0x141   : > { %s2282_s8 = smov 64   ;;  %s2283_s9 = smov 4  }
 0x142   : > { %2122 = dma.vmem_to_hbm [thread:$0]  (%p2344_p4), %s2612_s10, 512, %s2610_s21, %s2616_s23, %s2282_s8, %s2282_s8, %s2283_s9  }
 0x143 PF: > { %p2128_p0 = scmp.ge.s32.totalorder %s2279_s17, 2  ;;  %s1691_s11 = sand.u32 1, %s2259_s12  }
 0x144   : > { %s1692_s18 = scalar_lea.sflag [#allocation3], %s1691_s11 }
 0x145   : > { %p2125_p1 = pnand %p2128_p0, %p2351_p8 }
 0x147   : > { %p2126_p2 = pneg %p2125_p1 }
 0x149   : > { %2254 = dma.done.wait (%p2126_p2), %s1692_s18, 512  }
 0x14a   : > { %2256 = vsyncadd (%p2126_p2), %s1692_s18, 4294966784  ;;  %s16_s17 = sadd.s32 1, %s2279_s17   ;;  %s2669_s12 = smov %s2263_s13 }
 0x14b   : > { %p13_p3 = scmp.ge.s32.totalorder %s16_s17, 4   ;;  %s2670_s13 = smov %s2267_s14 }
 0x14c   : > { %s2671_s14 = smov %s2357_s25  ;;  %s2672_s15 = smov %s2275_s16 }
 0x14d   : > { %s2673_s16 = smov %s2675_s20  ;;  %15 = sbr.rel (!%p13_p3) target bundleno = 4 (0x4), region = 78 }
 0x152   :  { %1697 = vsyncpa [#allocation3], 1 }
 0x153   :  { %1699 = vsyncpa [#allocation3 + $0x1], 1 }

</bundles_post_ra>
